<compile_context>
chip_gen: v5e
topology: v5e:2x2
jax: 0.10.0
libtpu: 0.0.40
codegen_flags: <defaults>
</compile_context>

<pallas_src>
import functools

import jax
import jax.numpy as jnp
from jax.experimental import pallas as pl
from jax.experimental.pallas import tpu as pltpu


# ---------------------------------------------------------------------------
# Kernel
# ---------------------------------------------------------------------------
def make_mlp_kernel(ep_dtype):
    """Build the fused-MLP kernel with the given epilogue dtype.

    ep_dtype: dtype for the bias-add + LeakyReLU epilogue (bf16 on v6e/v7x,
    f32 on v5e where the VALU has no bf16 path).
    """

    def mlp_kernel(x_ref,
                   w1_ref, b1_ref,
                   w2_ref, b2_ref,
                   w3_ref, b3_ref,
                   w4_ref, b4_ref,
                   o_ref):
        def fused_layer(h_bf16, w_ref, b_ref):
            # bf16 MXU operands, f32 accumulation, ep_dtype epilogue.
            z = jnp.dot(w_ref[...], h_bf16, preferred_element_type=jnp.float32)
            z = z.astype(ep_dtype) + b_ref[...].astype(ep_dtype)
            # LeakyReLU(0.1) == max(z, 0.1*z) for slope in (0, 1): single vmax.
            return jnp.maximum(z, 0.1 * z)

        h = fused_layer(x_ref[...], w1_ref, b1_ref)                # (256, tb)
        h = fused_layer(h.astype(jnp.bfloat16), w2_ref, b2_ref)    # (128, tb)
        h = fused_layer(h.astype(jnp.bfloat16), w3_ref, b3_ref)    # ( 64, tb)

        # Final Linear(64 -> 1): a 1-column MXU matmul wastes the array; use a
        # VPU multiply + cross-sublane reduce (XLU). Result is (1, tb),
        # lane-dense with batch on lanes.
        z = jnp.sum(h.astype(jnp.float32) * w4_ref[...],
                    axis=0, keepdims=True) + b4_ref[...]           # (1, tb) f32
        o_ref[...] = (jax.nn.sigmoid(z) * 100.0).astype(o_ref.dtype)

    return mlp_kernel


# ---------------------------------------------------------------------------
# Wrappers
# ---------------------------------------------------------------------------
def default_epilogue_dtype():
    """bf16 epilogue on chips with bf16 VALUs (v6e/v7x), f32 otherwise."""
    try:
        kind = jax.devices()[0].device_kind.lower()
    except Exception:  # pragma: no cover - defensive
        return jnp.float32
    if ("v6" in kind) or ("v7" in kind) or ("7x" in kind):
        return jnp.bfloat16
    return jnp.float32


def _auto_tb(batch, *, max_tb=2048, min_tb=128, target_tiles=4):
    """Pick a batch tile: big enough to amortize per-step pipeline overhead,
    small enough to keep >= ~target_tiles grid steps (v7x 2-TC sharding) and
    to stay well inside scoped VMEM (cap 2048)."""
    tb = -(-max(int(batch), 1) // target_tiles)      # ceil(B / target_tiles)
    tb = ((tb + 127) // 128) * 128                   # lane multiple
    return int(max(min_tb, min(max_tb, tb)))


def mlp_forward_from_features(x_t, params, *, tb=None, ep_dtype=jnp.float32):
    """x_t: [d_in, B] bf16 feature slab (batch on lanes) -> [B, 1] f32 scores.

    tb: batch tile (multiple of 128). If None it is auto-sized. B is
    zero-padded to a multiple of tb on the lane axis; padded columns are
    discarded after the kernel.
    """
    d_in, B = x_t.shape
    if tb is None:
        tb = _auto_tb(B)
    num_tiles = pl.cdiv(B, tb)
    B_pad = num_tiles * tb
    if B_pad != B:
        x_t = jnp.pad(x_t, ((0, 0), (0, B_pad - B)))

    in_specs = [pl.BlockSpec((d_in, tb), lambda i: (0, i))]
    # Weights / biases: full-array blocks, same block every grid step
    # (no re-DMA across the batch loop).
    in_specs += [pl.BlockSpec(p.shape, lambda i: (0, 0)) for p in params]

    out = pl.pallas_call(
        make_mlp_kernel(ep_dtype),
        out_shape=jax.ShapeDtypeStruct((1, B_pad), jnp.float32),
        grid=(num_tiles,),
        in_specs=in_specs,
        out_specs=pl.BlockSpec((1, tb), lambda i: (0, i)),
        compiler_params=pltpu.CompilerParams(
            dimension_semantics=("parallel",),
            vmem_limit_bytes=32 * 1024 * 1024),
    )(x_t, *params)

    return out.reshape(B_pad, 1)[:B]


def build_features_t(user_ids, item_ids, emb_user_t, emb_item_t):
    """Gather + concat directly in the kernel's [d_in, B] bf16 layout.

    emb_user_t / emb_item_t are the pre-transposed [d, n] bf16 tables, so the
    gather is a column gather and no [B, d_in] f32 slab / transpose / cast is
    ever materialized in HBM.
    """
    vu = jnp.take(emb_user_t, user_ids, axis=1)      # (d_user, B)
    vi = jnp.take(emb_item_t, item_ids, axis=1)      # (d_item, B)
    return jnp.concatenate([vu, vi], axis=0)          # (d_user+d_item, B) bf16


def mlp_ncf_forward(user_ids, item_ids, emb_user_t, emb_item_t, params,
                    *, tb=None, ep_dtype=jnp.float32):
    """Full NCF-MLP forward: ids -> embeddings -> fused MLP kernel -> [B,1]."""
    x_t = build_features_t(user_ids, item_ids, emb_user_t, emb_item_t)
    return mlp_forward_from_features(x_t, params, tb=tb, ep_dtype=ep_dtype)


# ---------------------------------------------------------------------------
# Parameters (PyTorch [d_out, d_in] layout, eval-mode BatchNorm folded in)
# ---------------------------------------------------------------------------
def make_params(key, d_user, d_item, eps=1e-5):
    """Kernel-ready parameters [w1, b1, w2, b2, w3, b3, w4, b4]:
      w1..w3: bf16 [d_out, d_in] with eval-mode BatchNorm folded in
      b1..b3: f32  [d_out, 1]
      w4    : f32  [64, 1]  (final Linear column, VPU path)
      b4    : f32  [1, 1]
    """
    d_in = d_user + d_item
    dims = [d_in, 256, 128, 64]
    keys = jax.random.split(key, 14)
    params = []
    for li in range(3):
        din, dout = dims[li], dims[li + 1]
        k = keys[4 * li:4 * li + 4]
        w = jax.random.normal(k[0], (dout, din), jnp.float32) / jnp.sqrt(din)
        b = jax.random.normal(k[1], (dout, 1), jnp.float32) * 0.01
        # Eval-mode BatchNorm1d stats (non-trivial, to exercise the folding).
        gamma = 1.0 + 0.1 * jax.random.normal(k[2], (dout, 1), jnp.float32)
        beta = 0.05 * jax.random.normal(k[3], (dout, 1), jnp.float32)
        r_mean = 0.1 * jnp.ones((dout, 1), jnp.float32)
        r_var = jnp.ones((dout, 1), jnp.float32)
        scale = gamma / jnp.sqrt(r_var + eps)
        shift = beta - r_mean * scale
        w_f = w * scale                     # fold BN scale into the weight rows
        b_f = b * scale + shift             # fold BN into the bias
        params.extend([w_f.astype(jnp.bfloat16), b_f])

    # Final Linear(64 -> 1) stored as an f32 column (VPU multiply + reduce).
    w4 = jax.random.normal(keys[12], (64, 1), jnp.float32) / jnp.sqrt(64.0)
    b4 = jax.random.normal(keys[13], (1, 1), jnp.float32) * 0.01
    params.extend([w4, b4])
    return params


# ---------------------------------------------------------------------------
# Pure-JAX reference mirroring the kernel math
# ---------------------------------------------------------------------------
def mlp_reference(x_t_bf16, params, ep_dtype):
    w1, b1, w2, b2, w3, b3, w4, b4 = params

    def layer(h, w, b):
        z = jnp.dot(w, h, preferred_element_type=jnp.float32)
        z = z.astype(ep_dtype) + b.astype(ep_dtype)
        return jnp.maximum(z, 0.1 * z)

    h = layer(x_t_bf16, w1, b1)
    h = layer(h.astype(jnp.bfloat16), w2, b2)
    h = layer(h.astype(jnp.bfloat16), w3, b3)
    z = jnp.sum(h.astype(jnp.float32) * w4, axis=0, keepdims=True) + b4
    return (jax.nn.sigmoid(z) * 100.0).T            # [B, 1]


# ---------------------------------------------------------------------------
# Demo / self-test
# ---------------------------------------------------------------------------
if __name__ == "__main__":
    n_user, d_user = 100, 16
    n_item, d_item = 50, 16

    key = jax.random.PRNGKey(0)
    k_eu, k_ei, k_params, k_uid, k_iid, k_uid2, k_iid2 = jax.random.split(key, 7)

    # Embedding tables (nn.Embedding default init ~ N(0, 1)), pre-transposed
    # and stored bf16 so the gather produces the kernel layout directly.
    emb_user_t = jax.random.normal(k_eu, (n_user, d_user), jnp.float32).T.astype(jnp.bfloat16)
    emb_item_t = jax.random.normal(k_ei, (n_item, d_item), jnp.float32).T.astype(jnp.bfloat16)
    params = make_params(k_params, d_user, d_item)
    ep_dtype = default_epilogue_dtype()

    def make_ids(k_u, k_i, batch):
        uid = jax.random.randint(k_u, (batch,), 0, n_user)
        iid = jax.random.randint(k_i, (batch,), 0, n_item)
        return uid, iid

    fwd = jax.jit(functools.partial(
        mlp_ncf_forward, emb_user_t=emb_user_t, emb_item_t=emb_item_t,
        params=params, ep_dtype=ep_dtype))

    # --- Test 1: tiny batch (single tile, padded) ----------------------------
    batch = 8
    uid, iid = make_ids(k_uid, k_iid, batch)
    out = jax.block_until_ready(fwd(uid, iid))
    x_t = build_features_t(uid, iid, emb_user_t, emb_item_t)
    ref = jax.block_until_ready(mlp_reference(x_t, params, ep_dtype))
    assert out.shape == (batch, 1), out.shape
    assert bool(jnp.all(jnp.isfinite(out)))
    assert bool(jnp.all((out >= 0.0) & (out <= 100.0)))
    assert bool(jnp.allclose(out, ref, atol=0.1, rtol=1e-3)), (out, ref)

    # --- Test 2: multi-tile grid + remainder handling (explicit tb) ----------
    batch2 = 300
    uid2, iid2 = make_ids(k_uid2, k_iid2, batch2)
    out2 = jax.block_until_ready(
        mlp_ncf_forward(uid2, iid2, emb_user_t, emb_item_t, params,
                        tb=128, ep_dtype=ep_dtype))   # 3 tiles, 84 padded cols
    x_t2 = build_features_t(uid2, iid2, emb_user_t, emb_item_t)
    ref2 = jax.block_until_ready(mlp_reference(x_t2, params, ep_dtype))
    assert out2.shape == (batch2, 1), out2.shape
    assert bool(jnp.all(jnp.isfinite(out2)))
    assert bool(jnp.all((out2 >= 0.0) & (out2 <= 100.0)))
    assert bool(jnp.allclose(out2, ref2, atol=0.1, rtol=1e-3))

    print("KERNEL_OK")
</pallas_src>

<mosaic_0001>
module attributes {stable_mosaic.version = 11 : i64} {
  func.func @mlp_kernel(%arg0: i32, %arg1: memref<32x128xbf16, #tpu.memory_space<vmem>>, %arg2: memref<256x32xbf16, #tpu.memory_space<vmem>>, %arg3: memref<256x1xf32, #tpu.memory_space<vmem>>, %arg4: memref<128x256xbf16, #tpu.memory_space<vmem>>, %arg5: memref<128x1xf32, #tpu.memory_space<vmem>>, %arg6: memref<64x128xbf16, #tpu.memory_space<vmem>>, %arg7: memref<64x1xf32, #tpu.memory_space<vmem>>, %arg8: memref<64x1xf32, #tpu.memory_space<vmem>>, %arg9: memref<1x1xf32, #tpu.memory_space<vmem>>, %arg10: memref<1x128xf32, #tpu.memory_space<vmem>>) attributes {dimension_semantics = [#tpu.dimension_semantics<parallel>], iteration_bounds = array<i64: 1>, scalar_prefetch = 0 : i64, scratch_operands = 0 : i64, tpu.core_type = #tpu.core_type<tc>, window_params = [{transform_indices = @transform_0, window_bounds = array<i64: 32, 128>}, {pipeline_mode = #tpu.pipeline_mode<synchronous>, transform_indices = @transform_1, window_bounds = array<i64: 256, 32>}, {pipeline_mode = #tpu.pipeline_mode<synchronous>, transform_indices = @transform_2, window_bounds = array<i64: 256, 1>}, {pipeline_mode = #tpu.pipeline_mode<synchronous>, transform_indices = @transform_3, window_bounds = array<i64: 128, 256>}, {pipeline_mode = #tpu.pipeline_mode<synchronous>, transform_indices = @transform_4, window_bounds = array<i64: 128, 1>}, {pipeline_mode = #tpu.pipeline_mode<synchronous>, transform_indices = @transform_5, window_bounds = array<i64: 64, 128>}, {pipeline_mode = #tpu.pipeline_mode<synchronous>, transform_indices = @transform_6, window_bounds = array<i64: 64, 1>}, {pipeline_mode = #tpu.pipeline_mode<synchronous>, transform_indices = @transform_7, window_bounds = array<i64: 64, 1>}, {pipeline_mode = #tpu.pipeline_mode<synchronous>, transform_indices = @transform_8, window_bounds = array<i64: 1, 1>}, {transform_indices = @transform_9, window_bounds = array<i64: 1, 128>}]} {
    %c0 = arith.constant 0 : index
    %c0_0 = arith.constant 0 : index
    %0 = vector.load %arg1[%c0, %c0_0] : memref<32x128xbf16, #tpu.memory_space<vmem>>, vector<32x128xbf16>
    %c0_1 = arith.constant 0 : index
    %c0_2 = arith.constant 0 : index
    %1 = vector.load %arg2[%c0_1, %c0_2] : memref<256x32xbf16, #tpu.memory_space<vmem>>, vector<256x32xbf16>
    %cst = arith.constant dense<0.000000e+00> : vector<256x128xf32>
    %2 = tpu.matmul %1, %0, %cst {dimension_numbers = #tpu.dot_dimension_numbers<[1], [0], [0], [1], [0, 0, 1, 1], [], []>} : vector<256x32xbf16>, vector<32x128xbf16>, vector<256x128xf32> -> vector<256x128xf32>
    %c0_3 = arith.constant 0 : index
    %c0_4 = arith.constant 0 : index
    %3 = vector.load %arg3[%c0_3, %c0_4] : memref<256x1xf32, #tpu.memory_space<vmem>>, vector<256x1xf32>
    %4 = vector.broadcast %3 : vector<256x1xf32> to vector<256x128xf32>
    %5 = arith.addf %2, %4 : vector<256x128xf32>
    %cst_5 = arith.constant 1.000000e-01 : f32
    %6 = vector.broadcast %cst_5 : f32 to vector<256x128xf32>
    %7 = arith.mulf %6, %5 : vector<256x128xf32>
    %8 = arith.maximumf %5, %7 : vector<256x128xf32>
    %9 = arith.truncf %8 : vector<256x128xf32> to vector<256x128xbf16>
    %c0_6 = arith.constant 0 : index
    %c0_7 = arith.constant 0 : index
    %10 = vector.load %arg4[%c0_6, %c0_7] : memref<128x256xbf16, #tpu.memory_space<vmem>>, vector<128x256xbf16>
    %cst_8 = arith.constant dense<0.000000e+00> : vector<128x128xf32>
    %11 = tpu.matmul %10, %9, %cst_8 {dimension_numbers = #tpu.dot_dimension_numbers<[1], [0], [0], [1], [0, 0, 1, 1], [], []>} : vector<128x256xbf16>, vector<256x128xbf16>, vector<128x128xf32> -> vector<128x128xf32>
    %c0_9 = arith.constant 0 : index
    %c0_10 = arith.constant 0 : index
    %12 = vector.load %arg5[%c0_9, %c0_10] : memref<128x1xf32, #tpu.memory_space<vmem>>, vector<128x1xf32>
    %13 = vector.broadcast %12 : vector<128x1xf32> to vector<128x128xf32>
    %14 = arith.addf %11, %13 : vector<128x128xf32>
    %cst_11 = arith.constant 1.000000e-01 : f32
    %15 = vector.broadcast %cst_11 : f32 to vector<128x128xf32>
    %16 = arith.mulf %15, %14 : vector<128x128xf32>
    %17 = arith.maximumf %14, %16 : vector<128x128xf32>
    %18 = arith.truncf %17 : vector<128x128xf32> to vector<128x128xbf16>
    %c0_12 = arith.constant 0 : index
    %c0_13 = arith.constant 0 : index
    %19 = vector.load %arg6[%c0_12, %c0_13] : memref<64x128xbf16, #tpu.memory_space<vmem>>, vector<64x128xbf16>
    %cst_14 = arith.constant dense<0.000000e+00> : vector<64x128xf32>
    %20 = tpu.matmul %19, %18, %cst_14 {dimension_numbers = #tpu.dot_dimension_numbers<[1], [0], [0], [1], [0, 0, 1, 1], [], []>} : vector<64x128xbf16>, vector<128x128xbf16>, vector<64x128xf32> -> vector<64x128xf32>
    %c0_15 = arith.constant 0 : index
    %c0_16 = arith.constant 0 : index
    %21 = vector.load %arg7[%c0_15, %c0_16] : memref<64x1xf32, #tpu.memory_space<vmem>>, vector<64x1xf32>
    %22 = vector.broadcast %21 : vector<64x1xf32> to vector<64x128xf32>
    %23 = arith.addf %20, %22 : vector<64x128xf32>
    %cst_17 = arith.constant 1.000000e-01 : f32
    %24 = vector.broadcast %cst_17 : f32 to vector<64x128xf32>
    %25 = arith.mulf %24, %23 : vector<64x128xf32>
    %26 = arith.maximumf %23, %25 : vector<64x128xf32>
    %c0_18 = arith.constant 0 : index
    %c0_19 = arith.constant 0 : index
    %27 = vector.load %arg8[%c0_18, %c0_19] : memref<64x1xf32, #tpu.memory_space<vmem>>, vector<64x1xf32>
    %28 = vector.broadcast %27 : vector<64x1xf32> to vector<64x128xf32>
    %29 = arith.mulf %26, %28 : vector<64x128xf32>
    %cst_20 = arith.constant dense<0.000000e+00> : vector<128xf32>
    %30 = vector.multi_reduction <add>, %29, %cst_20 [0] : vector<64x128xf32> to vector<128xf32>
    %31 = vector.shape_cast %30 : vector<128xf32> to vector<1x128xf32>
    %c0_21 = arith.constant 0 : index
    %c0_22 = arith.constant 0 : index
    %32 = vector.load %arg9[%c0_21, %c0_22] : memref<1x1xf32, #tpu.memory_space<vmem>>, vector<1x1xf32>
    %33 = vector.broadcast %32 : vector<1x1xf32> to vector<1x128xf32>
    %34 = arith.addf %31, %33 : vector<1x128xf32>
    %35 = arith.negf %34 : vector<1x128xf32>
    %36 = math.exp %35 : vector<1x128xf32>
    %cst_23 = arith.constant 1.000000e+00 : f32
    %37 = vector.broadcast %cst_23 : f32 to vector<1x128xf32>
    %38 = arith.addf %37, %36 : vector<1x128xf32>
    %39 = arith.divf %37, %38 : vector<1x128xf32>
    %cst_24 = arith.constant 1.000000e+02 : f32
    %40 = vector.broadcast %cst_24 : f32 to vector<1x128xf32>
    %41 = arith.mulf %39, %40 : vector<1x128xf32>
    %c0_25 = arith.constant 0 : index
    %c0_26 = arith.constant 0 : index
    %42 = vector.load %arg10[%c0_25, %c0_26] : memref<1x128xf32, #tpu.memory_space<vmem>>, vector<1x128xf32>
    tpu.vector_store %arg10[%c0_25, %c0_26], %41 {strides = array<i32>} : memref<1x128xf32, #tpu.memory_space<vmem>>, vector<1x128xf32>,
    return
  }
  func.func @transform_0(%arg0: i32) -> (i32, i32) {
    %c0_i32 = arith.constant 0 : i32
    %c0_i32_0 = arith.constant 0 : i32
    return %c0_i32, %arg0 : i32, i32
  }
  func.func @transform_1(%arg0: i32) -> (i32, i32) {
    %c0_i32 = arith.constant 0 : i32
    %c0_i32_0 = arith.constant 0 : i32
    %c0_i32_1 = arith.constant 0 : i32
    return %c0_i32, %c0_i32_0 : i32, i32
  }
  func.func @transform_2(%arg0: i32) -> (i32, i32) {
    %c0_i32 = arith.constant 0 : i32
    %c0_i32_0 = arith.constant 0 : i32
    %c0_i32_1 = arith.constant 0 : i32
    return %c0_i32, %c0_i32_0 : i32, i32
  }
  func.func @transform_3(%arg0: i32) -> (i32, i32) {
    %c0_i32 = arith.constant 0 : i32
    %c0_i32_0 = arith.constant 0 : i32
    %c0_i32_1 = arith.constant 0 : i32
    return %c0_i32, %c0_i32_0 : i32, i32
  }
  func.func @transform_4(%arg0: i32) -> (i32, i32) {
    %c0_i32 = arith.constant 0 : i32
    %c0_i32_0 = arith.constant 0 : i32
    %c0_i32_1 = arith.constant 0 : i32
    return %c0_i32, %c0_i32_0 : i32, i32
  }
  func.func @transform_5(%arg0: i32) -> (i32, i32) {
    %c0_i32 = arith.constant 0 : i32
    %c0_i32_0 = arith.constant 0 : i32
    %c0_i32_1 = arith.constant 0 : i32
    return %c0_i32, %c0_i32_0 : i32, i32
  }
  func.func @transform_6(%arg0: i32) -> (i32, i32) {
    %c0_i32 = arith.constant 0 : i32
    %c0_i32_0 = arith.constant 0 : i32
    %c0_i32_1 = arith.constant 0 : i32
    return %c0_i32, %c0_i32_0 : i32, i32
  }
  func.func @transform_7(%arg0: i32) -> (i32, i32) {
    %c0_i32 = arith.constant 0 : i32
    %c0_i32_0 = arith.constant 0 : i32
    %c0_i32_1 = arith.constant 0 : i32
    return %c0_i32, %c0_i32_0 : i32, i32
  }
  func.func @transform_8(%arg0: i32) -> (i32, i32) {
    %c0_i32 = arith.constant 0 : i32
    %c0_i32_0 = arith.constant 0 : i32
    %c0_i32_1 = arith.constant 0 : i32
    return %c0_i32, %c0_i32_0 : i32, i32
  }
  func.func @transform_9(%arg0: i32) -> (i32, i32) {
    %c0_i32 = arith.constant 0 : i32
    %c0_i32_0 = arith.constant 0 : i32
    return %c0_i32, %arg0 : i32, i32
  }
}

</mosaic_0001>

<bundles_post_ra>
// kernel: mlp_ncf_forward.1
= control target key start
LH: loop header
LB: loop body
LE: loop exit
PB: predicated region body
PF: predicated region fallthrough
CT: control target
= control target key end

     0   :  { %s1858_s0 = inlined_call_operand.vmem [shape: bf16[32,128], index: 0, kind: input, shape index: {}]   ;;  %s1859_s1 = inlined_call_operand.hbm [shape: bf16[256,32], index: 1, kind: input, shape index: {}]   ;;  %s1860_s2 = inlined_call_operand.hbm [shape: f32[256,1], index: 2, kind: input, shape index: {}]   ;;  %s1861_s3 = inlined_call_operand.hbm [shape: bf16[128,256], index: 3, kind: input, shape index: {}]   ;;  %s1862_s4 = inlined_call_operand.vmem [shape: f32[128,1], index: 4, kind: input, shape index: {}]   ;;  %s1863_s5 = inlined_call_operand.vmem [shape: bf16[64,128], index: 5, kind: input, shape index: {}]   ;;  %s1864_s6 = inlined_call_operand.hbm [shape: f32[64,1], index: 6, kind: input, shape index: {}]   ;;  %s1865_s7 = inlined_call_operand.hbm [shape: f32[64,1], index: 7, kind: input, shape index: {}]   ;;  %s1866_s8 = inlined_call_operand.<no memory space> [shape: f32[1,1], index: 8, kind: input, shape index: {}]   ;;  %s1867_s9 = inlined_call_operand.vmem [shape: f32[1,128], index: 9, kind: output, shape index: {}]  }
   0x1   :  { %v14_v0 = vstv %s1866_s8 }
   0x2   :  { %15 = vst [vmem:[#allocation2] sm:$0x1] %v14_v0 }
   0x3   :  { %16 = vsyncpa [#allocation4], 0 }
   0x4   :  { %17 = vsyncpa [#allocation6], 0  ;;  %s38_s13 = sshll.u32 %s1860_s2, 4  ;;  %s39_s13 = int_to_ptr.hbm [resolvable:$true] %s38_s13 }
   0x5   :  { %18 = vsyncpa [#allocation9], 0  ;;  %s1563_s14 = smov [#allocation5]   ;;  %s68_s18 = sshll.u32 %s1864_s6, 4  ;;  %s69_s18 = int_to_ptr.hbm [resolvable:$true] %s68_s18 }
   0x6   :  { %s40_s15 = sshll.u32 %s1563_s14, 4  ;;  %s1564_s19 = smov 128   ;;  %s41_s15 = int_to_ptr.vmem [resolvable:$true] %s40_s15 }
   0x7   :  { %s1565_s20 = smov 8   ;;  %s1566_s8 = smov [#allocation8]  }
   0x8   :  { %46 = dma.hbm_to_vmem [thread:$0]  %s39_s13, 4096, %s41_s15, [#allocation6], %s1564_s19, %s1564_s19, %s1565_s20  }
   0x9   :  { %s70_s21 = sshll.u32 %s1566_s8, 4  ;;  %s25_s23 = sshll.u32 %s1859_s1, 4  ;;  %s71_s21 = int_to_ptr.vmem [resolvable:$true] %s70_s21  ;;  %s26_s23 = int_to_ptr.hbm [resolvable:$true] %s25_s23 }
   0xa   :  { %76 = dma.hbm_to_vmem [thread:$0]  %s69_s18, 1024, %s71_s21, [#allocation9], %s1564_s19, %s1564_s19, %s1565_s20  }
   0xb   :  { %s1567_s6 = smov [#allocation3]   ;;  %s51_s27 = sshll.u32 %s1861_s3, 4  ;;  %s52_s27 = int_to_ptr.hbm [resolvable:$true] %s51_s27 }
   0xc   :  { %s27_s24 = sshll.u32 %s1567_s6, 4  ;;  %s1568_s28 = smov 64   ;;  %s28_s24 = int_to_ptr.vmem [resolvable:$true] %s27_s24 }
   0xd   :  { %s1569_s29 = smov 4   ;;  %s1570_s30 = smov [#allocation7]  }
   0xe   :  { %33 = dma.hbm_to_vmem [thread:$0]  %s26_s23, 2048, %s28_s24, [#allocation4], %s1568_s28, %s1568_s28, %s1569_s29  }
   0xf   :  { %s53_s10 = sshll.u32 %s1570_s30, 4  ;;  %s81_s12 = sshll.u32 %s1865_s7, 4  ;;  %s54_s10 = int_to_ptr.vmem [resolvable:$true] %s53_s10  ;;  %s82_s12 = int_to_ptr.hbm [resolvable:$true] %s81_s12 }
  0x10   :  { %59 = dma.hbm_to_vmem [thread:$0]  %s52_s27, 2048, %s54_s10, [#allocation6], %s1564_s19, %s1564_s19, %s1565_s20  }
  0x11   :  { %s1571_s13 = smov [#allocation10]  }
  0x12   :  { %s83_s14 = sshll.u32 %s1571_s13, 4  ;;  %s84_s14 = int_to_ptr.vmem [resolvable:$true] %s83_s14 }
  0x13   :  { %89 = dma.hbm_to_vmem [thread:$0]  %s82_s12, 1024, %s84_s14, [#allocation9], %s1564_s19, %s1564_s19, %s1565_s20  }
  0x14   :  { %1557 = dma.done.wait [#allocation4], 2048  }
  0x15   :  { %1558 = vsyncadd [#allocation4], 4294965248 }
  0x16   :  { %1559 = dma.done.wait [#allocation6], 6144  }
  0x17   :  { %1560 = vsyncadd [#allocation6], 4294961152 }
  0x18   :  { %1561 = dma.done.wait [#allocation9], 2048  }
  0x19   :  { %1562 = vsyncadd [#allocation9], 4294965248  ;;  %v1572_v1 = vmov 0   ;;  %v179_v2 = vld [vmem:[#allocation5 + $0xf0] sm:$0xff]  ;;  %v177_v3 = vld [vmem:[#allocation5 + $0xe0] sm:$0xff]  ;;  %vm433_vm0 = vcmask 261120  }
  0x1a   :  { %1432 = vset.pattern.permute.xlu2 %v1572_v1  ;;  %1431 = vset.pattern.permute.xlu1 %v1572_v1  ;;  %v163_v4 = vld [vmem:[#allocation5 + $0x70] sm:$0xff]  ;;  %v1381_v5 = vld [vmem:[%s1858_s0 + $0x8] sm:$0xff]  ;;  %v1380_v6 = vld [vmem:[%s1858_s0] sm:$0xff] }
  0x1b   :  { %1430 = vset.pattern.permute.xlu0 %v1572_v1  ;;  %323 = vperm.xlu2 %1432, %v177_v3   ;;  %v180_v7 = vld [vmem:[#allocation5 + $0xf8] sm:$0xff]  ;;  %v178_v8 = vld [vmem:[#allocation5 + $0xe8] sm:$0xff]  ;;  %v1382_v9 = vld [vmem:[#allocation3] sm:$0xff] }
  0x1c   :  { %333 = vperm.xlu0 %1430, %v179_v2   ;;  %253 = vperm.xlu1 %1431, %v163_v4   ;;  %v164_v10 = vld [vmem:[#allocation5 + $0x78] sm:$0xff]  ;;  %v1392_v11 = vld [vmem:[#allocation3 + $0x50] sm:$0xff]  ;;  %v161_v13 = vld [vmem:[#allocation5 + $0x60] sm:$0xff] }
  0x1d   :  { %488 = vmatpush.bf16.msra.mxu0 %v1381_v5  ;;  %1418 = vmatpush.bf16.msra.mxu3 %v1381_v5  ;;  %v175_v12 = vld [vmem:[#allocation5 + $0xd0] sm:$0xff]  ;;  %v162_v14 = vld [vmem:[#allocation5 + $0x68] sm:$0xff]  ;;  %v176_v15 = vld [vmem:[#allocation5 + $0xd8] sm:$0xff] }
  0x1e   :  { %v160_v16 = vld [vmem:[#allocation5 + $0x58] sm:$0xff]  ;;  %v1383_v17 = vld [vmem:[#allocation3 + $0x8] sm:$0xff]  ;;  %v159_v18 = vld [vmem:[#allocation5 + $0x50] sm:$0xff] }
  0x1f   :  { %v1393_v19 = vld [vmem:[#allocation3 + $0x58] sm:$0xff]  ;;  %v173_v20 = vld [vmem:[#allocation5 + $0xc0] sm:$0xff]  ;;  %v174_v22 = vld [vmem:[#allocation5 + $0xc8] sm:$0xff] }
  0x20   :  { %v157_v21 = vld [vmem:[#allocation5 + $0x40] sm:$0xff]  ;;  %v158_v23 = vld [vmem:[#allocation5 + $0x48] sm:$0xff]  ;;  %v172_v24 = vld [vmem:[#allocation5 + $0xb8] sm:$0xff] }
  0x21   :  { %489 = vmatpush.bf16.msra.mxu0 %v1380_v6  ;;  %1419 = vmatpush.bf16.msra.mxu3 %v1380_v6  ;;  %v1384_v25 = vld [vmem:[#allocation3 + $0x10] sm:$0xff]  ;;  %v1394_v27 = vld [vmem:[#allocation3 + $0x60] sm:$0xff]  ;;  %v156_v30 = vld [vmem:[#allocation5 + $0x38] sm:$0xff] }
  0x22   :  { %v171_v26 = vld [vmem:[#allocation5 + $0xb0] sm:$0xff]  ;;  %v169_v28 = vld [vmem:[#allocation5 + $0xa0] sm:$0xff]  ;;  %v170_v31 = vld [vmem:[#allocation5 + $0xa8] sm:$0xff] }
  0x23   :  { %328 = vperm.xlu2 %1432, %v178_v8   ;;  %v155_v29 = vld [vmem:[#allocation5 + $0x30] sm:$0xff]  ;;  %v154_v32 = vld [vmem:[#allocation5 + $0x28] sm:$0xff]  ;;  %v1385_v33 = vld [vmem:[#allocation3 + $0x18] sm:$0xff] }
  0x24   :  { %338 = vperm.xlu0 %1430, %v180_v7   ;;  %258 = vperm.xlu1 %1431, %v164_v10   ;;  %v153_v34 = vld [vmem:[#allocation5 + $0x20] sm:$0xff]  ;;  %v1395_v35 = vld [vmem:[#allocation3 + $0x68] sm:$0xff]  ;;  %v167_v36 = vld [vmem:[#allocation5 + $0x90] sm:$0xff] }
  0x25   :  { %1283 = vmatmul.msk.bf16.vlgmr.msra.gmra.mxu0 %vm433_vm0, %v1382_v9  ;;  %1293 = vmatmul.msk.bf16.vlgmr.msra.gmra.mxu3 %vm433_vm0, %v1392_v11  ;;  %v151_v37 = vld [vmem:[#allocation5 + $0x10] sm:$0xff]  ;;  %v168_v38 = vld [vmem:[#allocation5 + $0x98] sm:$0xff]  ;;  %v166_v40 = vld [vmem:[#allocation5 + $0x88] sm:$0xff] }
  0x26   :  { %v152_v39 = vld [vmem:[#allocation5 + $0x18] sm:$0xff]  ;;  %v1386_v41 = vld [vmem:[#allocation3 + $0x20] sm:$0xff]  ;;  %v1396_v43 = vld [vmem:[#allocation3 + $0x70] sm:$0xff] }
  0x27   :  { %v165_v42 = vld [vmem:[#allocation5 + $0x80] sm:$0xff]  ;;  %v681_v44 = vld [vmem:[%s1862_s4 + $0x70] sm:$0xff]  ;;  %v682_v48 = vld [vmem:[%s1862_s4 + $0x78] sm:$0xff] }
  0x28   :  { %v149_v45 = vld [vmem:[#allocation5] sm:$0xff]  ;;  %v150_v46 = vld [vmem:[#allocation5 + $0x8] sm:$0xff]  ;;  %v1397_v51 = vld [vmem:[#allocation3 + $0x78] sm:$0xff] }
  0x29   :  { %v680_v47 = vld [vmem:[%s1862_s4 + $0x68] sm:$0xff]  ;;  %v679_v50 = vld [vmem:[%s1862_s4 + $0x60] sm:$0xff]  ;;  %v677_v53 = vld [vmem:[%s1862_s4 + $0x50] sm:$0xff] }
  0x2a   :  { %v1387_v49 = vld [vmem:[#allocation3 + $0x28] sm:$0xff]  ;;  %v675_v52 = vld [vmem:[%s1862_s4 + $0x40] sm:$0xff]  ;;  %v678_v54 = vld [vmem:[%s1862_s4 + $0x58] sm:$0xff] }
  0x2b   :  { %313 = vperm.xlu2 %1432, %v175_v12   ;;  %v674_v56 = vld [vmem:[%s1862_s4 + $0x38] sm:$0xff]  ;;  %v676_v57 = vld [vmem:[%s1862_s4 + $0x48] sm:$0xff]  ;;  %v673_v59 = vld [vmem:[%s1862_s4 + $0x30] sm:$0xff] }
  0x2c   :  { %243 = vperm.xlu0 %1430, %v161_v13   ;;  %248 = vperm.xlu1 %1431, %v162_v14   ;;  %v1388_v58 = vld [vmem:[#allocation3 + $0x30] sm:$0xff]  ;;  %v671_v61 = vld [vmem:[%s1862_s4 + $0x20] sm:$0xff]  ;;  %v672_v63 = vld [vmem:[%s1862_s4 + $0x28] sm:$0xff] }
  0x2d   :  { %v669_v60 = vld [vmem:[%s1862_s4 + $0x10] sm:$0xff]  ;;  %v668_v2 = vld [vmem:[%s1862_s4 + $0x8] sm:$0xff]  ;;  %v670_v3 = vld [vmem:[%s1862_s4 + $0x18] sm:$0xff] }
  0x2e   :  { %v1389_v4 = vld [vmem:[#allocation3 + $0x38] sm:$0xff]  ;;  %v991_v9 = vld [vmem:[#allocation8 + $0x10] sm:$0xff]  ;;  %v989_v10 = vld [vmem:[#allocation8] sm:$0xff] }
  0x2f   :  { %v667_v5 = vld [vmem:[%s1862_s4] sm:$0xff]  ;;  %v990_v11 = vld [vmem:[#allocation8 + $0x8] sm:$0xff] }
  0x33   :  { %238 = vperm.xlu2 %1432, %v160_v16   ;;  %v992_v16 = vld [vmem:[#allocation8 + $0x18] sm:$0xff] }
  0x34   :  { %318 = vperm.xlu0 %1430, %v176_v15   ;;  %233 = vperm.xlu1 %1431, %v159_v18   ;;  %v1106_v15 = vld [vmem:[#allocation10] sm:$0xff] }
  0x35   :  { %1284 = vmatmul.msk.bf16.gmra.mxu0 %vm433_vm0, %v1383_v17  ;;  %1294 = vmatmul.msk.bf16.gmra.mxu3 %vm433_vm0, %v1393_v19  ;;  %v1390_v17 = vld [vmem:[#allocation3 + $0x40] sm:$0xff] }
  0x36   :  { %v993_v19 = vld [vmem:[#allocation8 + $0x20] sm:$0xff] }
  0x3b   :  { %223 = vperm.xlu2 %1432, %v157_v21  }
  0x3c   :  { %303 = vperm.xlu0 %1430, %v173_v20   ;;  %308 = vperm.xlu1 %1431, %v174_v22  }
  0x43   :  { %298 = vperm.xlu2 %1432, %v172_v24   ;;  %v1108_v24 = vld [vmem:[#allocation10 + $0x10] sm:$0xff] }
  0x44   :  { %228 = vperm.xlu0 %1430, %v158_v23   ;;  %293 = vperm.xlu1 %1431, %v171_v26  }
  0x45   :  { %1285 = vmatmul.msk.bf16.gmra.mxu0 %vm433_vm0, %v1384_v25  ;;  %1295 = vmatmul.msk.bf16.gmra.mxu3 %vm433_vm0, %v1394_v27  ;;  %v1107_v25 = vld [vmem:[#allocation10 + $0x8] sm:$0xff] }
  0x46   :  { %v994_v27 = vld [vmem:[#allocation8 + $0x28] sm:$0xff] }
  0x4b   :  { %283 = vperm.xlu2 %1432, %v169_v28  }
  0x4c   :  { %213 = vperm.xlu0 %1430, %v155_v29   ;;  %218 = vperm.xlu1 %1431, %v156_v30  }
  0x53   :  { %208 = vperm.xlu2 %1432, %v154_v32   ;;  %v995_v32 = vld [vmem:[#allocation8 + $0x30] sm:$0xff] }
  0x54   :  { %288 = vperm.xlu0 %1430, %v170_v31   ;;  %203 = vperm.xlu1 %1431, %v153_v34   ;;  %v996_v31 = vld [vmem:[#allocation8 + $0x38] sm:$0xff] }
  0x55   :  { %1286 = vmatmul.msk.bf16.gmra.mxu0 %vm433_vm0, %v1385_v33  ;;  %1296 = vmatmul.msk.bf16.gmra.mxu3 %vm433_vm0, %v1395_v35  ;;  %v1391_v33 = vld [vmem:[#allocation3 + $0x48] sm:$0xff] }
  0x5b   :  { %193 = vperm.xlu2 %1432, %v151_v37  }
  0x5c   :  { %273 = vperm.xlu0 %1430, %v167_v36   ;;  %278 = vperm.xlu1 %1431, %v168_v38   ;;  %v1109_v36 = vld [vmem:[#allocation10 + $0x18] sm:$0xff] }
  0x63   :  { %268 = vperm.xlu2 %1432, %v166_v40   ;;  %v1112_v40 = vld [vmem:[#allocation10 + $0x30] sm:$0xff] }
  0x64   :  { %198 = vperm.xlu0 %1430, %v152_v39   ;;  %263 = vperm.xlu1 %1431, %v165_v42  }
  0x65   :  { %1287 = vmatmul.msk.bf16.gmra.mxu0 %vm433_vm0, %v1386_v41  ;;  %1297 = vmatmul.msk.bf16.gmra.mxu3 %vm433_vm0, %v1396_v43  ;;  %v1110_v41 = vld [vmem:[#allocation10 + $0x20] sm:$0xff]  ;;  %v1111_v43 = vld [vmem:[#allocation10 + $0x28] sm:$0xff] }
  0x6b   :  { %755 = vperm.xlu2 %1432, %v681_v44  }
  0x6c   :  { %183 = vperm.xlu0 %1430, %v149_v45   ;;  %188 = vperm.xlu1 %1431, %v150_v46  }
  0x73   :  { %750 = vperm.xlu2 %1432, %v680_v47  }
  0x74   :  { %760 = vperm.xlu0 %1430, %v682_v48   ;;  %745 = vperm.xlu1 %1431, %v679_v50  }
  0x75   :  { %1288 = vmatmul.msk.bf16.gmra.mxu0 %vm433_vm0, %v1387_v49  ;;  %1298 = vmatmul.msk.bf16.gmra.mxu3 %vm433_vm0, %v1397_v51  ;;  %v1692_v55 = vpop.permute.xlu2 %323  ;;  %v1113_v51 = vld [vmem:[#allocation10 + $0x38] sm:$0xff] }
  0x7b   :  { %725 = vperm.xlu2 %1432, %v675_v52  }
  0x7c   :  { %735 = vperm.xlu0 %1430, %v677_v53   ;;  %740 = vperm.xlu1 %1431, %v678_v54   ;;  %v1175_v54 = vld [vmem:[#allocation2] sm:$0x1] }
  0x7d   :  { %v1710_v62 = vpop.permute.xlu2 %328 }
  0x83   :  { %720 = vperm.xlu2 %1432, %v674_v56  }
  0x84   :  { %730 = vperm.xlu0 %1430, %v676_v57   ;;  %715 = vperm.xlu1 %1431, %v673_v59  }
  0x85   :  { %1289 = vmatmul.msk.bf16.gmra.mxu0 %vm433_vm0, %v1388_v58  ;;  %v1728_v6 = vpop.permute.xlu2 %313 }
  0x8b   :  { %695 = vperm.xlu2 %1432, %v669_v60  }
  0x8c   :  { %705 = vperm.xlu0 %1430, %v671_v61   ;;  %710 = vperm.xlu1 %1431, %v672_v63  }
  0x8d   :  { %v1735_v12 = vpop.permute.xlu2 %238 }
  0x8e   :  { %v1715_v0 = vpop.permute.xlu0 %333  ;;  %v1717_v1 = vpop.permute.xlu1 %253 }
  0x93   :  { %690 = vperm.xlu2 %1432, %v668_v2  }
  0x94   :  { %700 = vperm.xlu0 %1430, %v670_v3   ;;  %685 = vperm.xlu1 %1431, %v667_v5  }
  0x95   :  { %1290 = vmatmul.msk.bf16.gmra.mxu0 %vm433_vm0, %v1389_v4  ;;  %v1748_v22 = vpop.permute.xlu2 %223 }
  0x96   :  { %v1731_v7 = vpop.permute.xlu0 %338  ;;  %v1733_v8 = vpop.permute.xlu1 %258 }
  0x9b   :  { %1009 = vperm.xlu2 %1432, %v991_v9  }
  0x9c   :  { %999 = vperm.xlu0 %1430, %v989_v10   ;;  %1004 = vperm.xlu1 %1431, %v990_v11  }
  0x9d   :  { %v299_v34 = vpop.permute.xlu2 %298 }
  0x9e   :  { %v1737_v13 = vpop.permute.xlu0 %243  ;;  %v1739_v14 = vpop.permute.xlu1 %248 }
  0xa2   :  { %v1741_v18 = vpop.f32.mrf.mxu0 }
  0xa3   :  { %1116 = vperm.xlu2 %1432, %v1106_v15  }
  0xa4   :  { %1014 = vperm.xlu0 %1430, %v992_v16   ;;  %1019 = vperm.xlu1 %1431, %v993_v19  }
  0xa5   :  { %1291 = vmatmul.msk.bf16.gmra.mxu0 %vm433_vm0, %v1390_v17  ;;  %v284_v44 = vpop.permute.xlu2 %283 }
  0xa6   :  { %v1744_v20 = vpop.permute.xlu0 %318  ;;  %v1746_v21 = vpop.permute.xlu1 %233 }
  0xa8   :  { %v541_v23 = vpop.f32.mrf.mxu3 }
  0xa9   :  { %v542_v49 = vadd.f32 %v541_v23, %v284_v44 }
  0xaa   :  { %v1750_v26 = vpop.f32.mrf.mxu0 }
  0xab   :  { %1126 = vperm.xlu2 %1432, %v1108_v24   ;;  %v591_v58 = vmul.f32 0.1, %v542_v49 }
  0xac   :  { %1121 = vperm.xlu0 %1430, %v1107_v25   ;;  %1024 = vperm.xlu1 %1431, %v994_v27  }
  0xad   :  { %v209_v59 = vpop.permute.xlu2 %208  ;;  %v623_v5 = vmax.f32 %v542_v49, %v591_v58 }
  0xae   :  { %v1752_v28 = vpop.permute.xlu0 %303  ;;  %v1754_v29 = vpop.permute.xlu1 %308 }
  0xb0   :  { %v543_v30 = vpop.f32.mrf.mxu3 }
  0xb2   :  { %v496_v35 = vpop.f32.mrf.mxu0 }
  0xb3   :  { %1034 = vperm.xlu2 %1432, %v996_v31  }
  0xb4   :  { %1029 = vperm.xlu0 %1430, %v995_v32   ;;  %1131 = vperm.xlu1 %1431, %v1109_v36  }
  0xb5   :  { %1292 = vmatmul.msk.bf16.gmra.mxu0 %vm433_vm0, %v1391_v33  ;;  %v194_v31 = vpop.permute.xlu2 %193 }
  0xb6   :  { %v1757_v37 = vpop.permute.xlu0 %228  ;;  %v294_v38 = vpop.permute.xlu1 %293  ;;  %v497_v36 = vadd.f32 %v496_v35, %v194_v31 }
  0xb8   :  { %v546_v39 = vpop.f32.mrf.mxu3 }
  0xb9   :  { %v547_v45 = vadd.f32 %v546_v39, %v294_v38  ;;  %v573_v39 = vmul.f32 0.1, %v497_v36 }
  0xba   :  { %v498_v42 = vpop.f32.mrf.mxu0 }
  0xbb   :  { %1146 = vperm.xlu2 %1432, %v1112_v40   ;;  %v593_v48 = vmul.f32 0.1, %v547_v45  ;;  %v605_v49 = vmax.f32 %v497_v36, %v573_v39 }
  0xbc   :  { %1136 = vperm.xlu0 %1430, %v1110_v41   ;;  %1141 = vperm.xlu1 %1431, %v1111_v43  }
  0xbd   :  { %v625_v56 = vmax.f32 %v547_v45, %v593_v48 }
  0xbe   :  { %v214_v46 = vpop.permute.xlu0 %213  ;;  %v219_v47 = vpop.permute.xlu1 %218 }
  0xc0   :  { %v548_v50 = vpop.f32.mrf.mxu3 }
  0xc1   :  { %v549_v52 = vadd.f32 %v548_v50, %v299_v34 }
  0xc2   :  { %v501_v53 = vpop.f32.mrf.mxu0 }
  0xc3   :  { %v594_v57 = vmul.f32 0.1, %v549_v52 }
  0xc4   :  { %1151 = vperm.xlu0 %1430, %v1113_v51   ;;  %1178 = vperm.xlu1 %1431, %v1175_v54  }
  0xc5   :  { %v626_v60 = vmax.f32 %v549_v52, %v594_v57 }
  0xc6   :  { %v289_v61 = vpop.permute.xlu0 %288  ;;  %v204_v2 = vpop.permute.xlu1 %203 }
  0xc7   :  { %v544_v63 = vadd.f32 %v543_v30, %v289_v61  ;;  %v502_v3 = vadd.f32 %v501_v53, %v204_v2  ;;  %v1759_v4 = vpack.c.bf16 %v626_v60, %v625_v56 }
  0xc8   :  { %v1761_v10 = vpop.f32.mrf.mxu3 }
  0xc9   :  { %v592_v9 = vmul.f32 0.1, %v544_v63  ;;  %v575_v16 = vmul.f32 0.1, %v502_v3 }
  0xca   :  { %v503_v11 = vpop.f32.mrf.mxu0 }
  0xcb   :  { %v624_v15 = vmax.f32 %v544_v63, %v592_v9  ;;  %v504_v17 = vadd.f32 %v503_v11, %v209_v59  ;;  %v607_v25 = vmax.f32 %v502_v3, %v575_v16 }
  0xcd   :  { %v576_v19 = vmul.f32 0.1, %v504_v17  ;;  %v1763_v23 = vpack.c.bf16 %v624_v15, %v623_v5 }
  0xce   :  { %v1765_v24 = vpop.permute.xlu0 %273  ;;  %v1767_v30 = vpop.permute.xlu1 %278 }
  0xcf   :  { %v608_v27 = vmax.f32 %v504_v17, %v576_v19 }
  0xd0   :  { %v553_v32 = vpop.f32.mrf.mxu3 }
  0xd1   :  { %v1769_v33 = vpack.c.bf16 %v608_v27, %v607_v25 }
  0xd2   :  { %v506_v34 = vpop.f32.mrf.mxu0 }
  0xd3   :  { %v507_v40 = vadd.f32 %v506_v34, %v214_v46 }
  0xd5   :  { %v577_v50 = vmul.f32 0.1, %v507_v40 }
  0xd6   :  { %v199_v38 = vpop.permute.xlu0 %198  ;;  %v1771_v41 = vpop.permute.xlu1 %263 }
  0xd7   :  { %v499_v43 = vadd.f32 %v498_v42, %v199_v38  ;;  %v609_v57 = vmax.f32 %v507_v40, %v577_v50 }
  0xd8   :  { %v556_v45 = vpop.f32.mrf.mxu3 }
  0xd9   :  { %v574_v44 = vmul.f32 0.1, %v499_v43  ;;  %v557_v38 = vadd.f32 %v556_v45, %v1728_v6 }
  0xda   :  { %v508_v48 = vpop.f32.mrf.mxu0 }
  0xdb   :  { %v606_v51 = vmax.f32 %v499_v43, %v574_v44  ;;  %v509_v52 = vadd.f32 %v508_v48, %v219_v47 }
  0xdd   :  { %v578_v53 = vmul.f32 0.1, %v509_v52  ;;  %v1773_v54 = vpack.c.bf16 %v606_v51, %v605_v49 }
  0xde   :  { %v184_v56 = vpop.permute.xlu0 %183  ;;  %v189_v35 = vpop.permute.xlu1 %188 }
  0xdf   :  { %v610_v58 = vmax.f32 %v509_v52, %v578_v53  ;;  %v492_v59 = vadd.f32 %v1741_v18, %v184_v56  ;;  %v494_v46 = vadd.f32 %v1750_v26, %v189_v35 }
  0xe0   :  { %v558_v42 = vpop.f32.mrf.mxu3 }
  0xe1   :  { %v571_v60 = vmul.f32 0.1, %v492_v59  ;;  %v1777_v61 = vpack.c.bf16 %v610_v58, %v609_v57  ;;  %v572_v63 = vmul.f32 0.1, %v494_v46  ;;  %v559_v39 = vadd.f32 %v558_v42, %v1744_v20 }
  0xe2   :  { %v1779_v2 = vpop.f32.mrf.mxu0 }
  0xe3   :  { %v603_v3 = vmax.f32 %v492_v59, %v571_v60  ;;  %v604_v47 = vmax.f32 %v494_v46, %v572_v63  ;;  %v598_v50 = vmul.f32 0.1, %v559_v39 }
  0xe5   :  { %v1781_v5 = vpack.c.bf16 %v604_v47, %v603_v3  ;;  %v630_v56 = vmax.f32 %v559_v39, %v598_v50 }
  0xe8   :  { %v561_v9 = vpop.f32.mrf.mxu3 }
  0xe9   :  { %v562_v26 = vadd.f32 %v561_v9, %v1692_v55  ;;  %v554_v55 = vadd.f32 %v553_v32, %v1754_v29 }
  0xea   :  { %v513_v11 = vpop.f32.mrf.mxu0 }
  0xeb   :  { %v599_v40 = vmul.f32 0.1, %v562_v26  ;;  %v596_v45 = vmul.f32 0.1, %v554_v55 }
  0xed   :  { %v631_v51 = vmax.f32 %v562_v26, %v599_v40  ;;  %v628_v35 = vmax.f32 %v554_v55, %v596_v45  ;;  %v1399_v55 = vld [vmem:[#allocation7 + $0x4] sm:$0xf0] }
  0xf0   :  { %v563_v15 = vpop.f32.mrf.mxu3 }
  0xf1   :  { %v564_v25 = vadd.f32 %v563_v15, %v1710_v62  ;;  %v597_v62 = vmul.f32 0.1, %v557_v38 }
  0xf2   :  { %v516_v16 = vpop.f32.mrf.mxu0 }
  0xf3   :  { %v600_v43 = vmul.f32 0.1, %v564_v25  ;;  %v629_v20 = vmax.f32 %v557_v38, %v597_v62  ;;  %v517_v15 = vadd.f32 %v516_v16, %v1746_v21 }
  0xf5   :  { %v632_v52 = vmax.f32 %v564_v25, %v600_v43  ;;  %v648_v59 = vpack.c.bf16 %v630_v56, %v629_v20  ;;  %v1401_v20 = vld [vmem:[#allocation7 + $0x14] sm:$0xf0] }
  0xf7   :  { %v649_v57 = vpack.c.bf16 %v632_v52, %v631_v51 }
  0xf8   :  { %v566_v17 = vpop.f32.mrf.mxu3 }
  0xf9   :  { %v567_v18 = vadd.f32 %v566_v17, %v1715_v0  ;;  %v552_v0 = vadd.f32 %v1761_v10, %v1752_v28 }
  0xfa   :  { %v518_v19 = vpop.f32.mrf.mxu0 }
  0xfb   :  { %v601_v31 = vmul.f32 0.1, %v567_v18  ;;  %v595_v6 = vmul.f32 0.1, %v552_v0  ;;  %v519_v3 = vadd.f32 %v518_v19, %v1735_v12 }
  0xfd   :  { %v633_v48 = vmax.f32 %v567_v18, %v601_v31  ;;  %v627_v58 = vmax.f32 %v552_v0, %v595_v6  ;;  %v1301_v0 = vld [vmem:[#allocation7] sm:$0xf]  ;;  %v1303_v6 = vld [vmem:[#allocation7 + $0x8] sm:$0xf0] }
  0xfe   :  { %v1302_v51 = vor.u32 %v1399_v55, %v1301_v0 }
  0xff   :  { %v647_v10 = vpack.c.bf16 %v628_v35, %v627_v58  ;;  %v1311_v58 = vld [vmem:[#allocation7 + $0x18] sm:$0xf0] }
 0x100   :  { %v568_v27 = vpop.f32.mrf.mxu3 }
 0x101   :  { %v569_v34 = vadd.f32 %v568_v27, %v1731_v7  ;;  %v581_v27 = vmul.f32 0.1, %v517_v15 }
 0x102   :  { %v521_v36 = vpop.f32.mrf.mxu0 }
 0x103   :  { %v602_v44 = vmul.f32 0.1, %v569_v34  ;;  %v522_v60 = vadd.f32 %v521_v36, %v1737_v13  ;;  %v613_v21 = vmax.f32 %v517_v15, %v581_v27  ;;  %v1407_v15 = vld [vmem:[#allocation7 + $0x44] sm:$0xf0] }
 0x105   :  { %v634_v49 = vmax.f32 %v569_v34, %v602_v44  ;;  %v583_v17 = vmul.f32 0.1, %v522_v60 }
 0x107   :  { %v650_v7 = vpack.c.bf16 %v634_v49, %v633_v48  ;;  %v615_v12 = vmax.f32 %v522_v60, %v583_v17  ;;  %v1405_v60 = vld [vmem:[#allocation7 + $0x34] sm:$0xf0] }
 0x109   :  { %892 = vmatpush.bf16.msra.mxu2 %v650_v7 }
 0x10a   :  { %v523_v53 = vpop.f32.mrf.mxu0 }
 0x10b   :  { %v524_v32 = vadd.f32 %v523_v53, %v1739_v14  ;;  %v514_v14 = vadd.f32 %v513_v11, %v1757_v37 }
 0x10d   :  { %893 = vmatpush.bf16.msra.mxu2 %v649_v57  ;;  %v584_v47 = vmul.f32 0.1, %v524_v32  ;;  %v580_v19 = vmul.f32 0.1, %v514_v14  ;;  %v1400_v57 = vld [vmem:[#allocation7 + $0x14] sm:$0xf] }
 0x10e   :  { %v1314_v35 = vor.u32 %v1400_v57, %v1311_v58 }
 0x10f   :  { %v616_v26 = vmax.f32 %v524_v32, %v584_v47  ;;  %v612_v16 = vmax.f32 %v514_v14, %v580_v19  ;;  %v1411_v19 = vld [vmem:[#allocation7 + $0x64] sm:$0xf0] }
 0x111   :  { %894 = vmatpush.bf16.msra.mxu2 %v648_v59  ;;  %v1403_v59 = vld [vmem:[#allocation7 + $0x24] sm:$0xf0] }
 0x112   :  { %v526_v28 = vpop.f32.mrf.mxu0 }
 0x113   :  { %v527_v29 = vadd.f32 %v526_v28, %v1717_v1 }
 0x115   :  { %895 = vmatpush.bf16.msra.mxu2 %v647_v10  ;;  %v585_v42 = vmul.f32 0.1, %v527_v29  ;;  %v1402_v10 = vld [vmem:[#allocation7 + $0x24] sm:$0xf] }
 0x117   :  { %v617_v1 = vmax.f32 %v527_v29, %v585_v42  ;;  %v1319_v29 = vld [vmem:[#allocation7 + $0x28] sm:$0xf0] }
 0x118   :  { %v1322_v32 = vor.u32 %v1402_v10, %v1319_v29 }
 0x119   :  { %896 = vmatpush.bf16.msra.mxu2 %v1759_v4  ;;  %v582_v4 = vmul.f32 0.1, %v519_v3 }
 0x11a   :  { %v528_v46 = vpop.f32.mrf.mxu0 }
 0x11b   :  { %v529_v63 = vadd.f32 %v528_v46, %v1733_v8  ;;  %v512_v8 = vadd.f32 %v1779_v2, %v1748_v22  ;;  %v614_v31 = vmax.f32 %v519_v3, %v582_v4  ;;  %v269_v2 = vpop.permute.xlu2 %268  ;;  %v1325_v46 = vld [vmem:[#allocation7 + $0x30] sm:$0xf]  ;;  %v1327_v3 = vld [vmem:[#allocation7 + $0x38] sm:$0xf0] }
 0x11c   :  { %v1326_v42 = vor.u32 %v1405_v60, %v1325_v46  ;;  %v1341_v4 = vld [vmem:[#allocation7 + $0x50] sm:$0xf] }
 0x11d   :  { %v586_v9 = vmul.f32 0.1, %v529_v63  ;;  %897 = vmatpush.bf16.msra.mxu2 %v1763_v23  ;;  %v641_v23 = vpack.c.bf16 %v616_v26, %v615_v12  ;;  %v579_v34 = vmul.f32 0.1, %v512_v8  ;;  %v640_v36 = vpack.c.bf16 %v614_v31, %v613_v21  ;;  %v1409_v26 = vld [vmem:[#allocation7 + $0x54] sm:$0xf0] }
 0x11e   :  { %v1349_v12 = vld [vmem:[#allocation7 + $0x60] sm:$0xf]  ;;  %v1410_v21 = vld [vmem:[#allocation7 + $0x64] sm:$0xf] }
 0x11f   :  { %v618_v18 = vmax.f32 %v529_v63, %v586_v9  ;;  %v611_v37 = vmax.f32 %v512_v8, %v579_v34  ;;  %v1404_v63 = vld [vmem:[#allocation7 + $0x34] sm:$0xf]  ;;  %v1333_v9 = vld [vmem:[#allocation7 + $0x40] sm:$0xf]  ;;  %v1343_v8 = vld [vmem:[#allocation7 + $0x58] sm:$0xf0]  ;;  %v1350_v31 = vor.u32 %v1411_v19, %v1349_v12  ;;  %v1812_v34 = vpop.permute.xlu1 %745 }
 0x120   :  { %v1330_v47 = vor.u32 %v1404_v63, %v1327_v3  ;;  %v1334_v17 = vor.u32 %v1407_v15, %v1333_v9 }
 0x121   :  { %v642_v25 = vpack.c.bf16 %v618_v18, %v617_v1  ;;  %v639_v11 = vpack.c.bf16 %v612_v16, %v611_v37  ;;  %v1406_v1 = vld [vmem:[#allocation7 + $0x44] sm:$0xf]  ;;  %v1335_v18 = vld [vmem:[#allocation7 + $0x48] sm:$0xf0]  ;;  %v1357_v37 = vld [vmem:[#allocation7 + $0x70] sm:$0xf] }
 0x122   :  { %v531_v13 = vpop.f32.mrf.mxu0  ;;  %v1338_v14 = vor.u32 %v1406_v1, %v1335_v18  ;;  %v1351_v16 = vld [vmem:[#allocation7 + $0x68] sm:$0xf0] }
 0x123   :  { %843 = vmatpush.bf16.msra.mxu1 %v642_v25  ;;  %v532_v44 = vadd.f32 %v531_v13, %v1771_v41  ;;  %v1398_v41 = vld [vmem:[#allocation7 + $0x4] sm:$0xf]  ;;  %v1342_v25 = vor.u32 %v1409_v26, %v1341_v4  ;;  %v1408_v13 = vld [vmem:[#allocation7 + $0x54] sm:$0xf] }
 0x124   :  { %v1306_v45 = vor.u32 %v1398_v41, %v1303_v6  ;;  %v1346_v27 = vor.u32 %v1408_v13, %v1343_v8 }
 0x127   :  { %844 = vmatpush.bf16.msra.mxu1 %v641_v23  ;;  %v1810_v23 = vpop.permute.xlu2 %755 }
 0x12a   :  { %v533_v38 = vpop.f32.mrf.mxu0 }
 0x12b   :  { %845 = vmatpush.bf16.msra.mxu1 %v640_v36  ;;  %v534_v40 = vadd.f32 %v533_v38, %v269_v2  ;;  %v1354_v36 = vor.u32 %v1410_v21, %v1351_v16  ;;  %v1412_v2 = vld [vmem:[#allocation7 + $0x74] sm:$0xf] }
 0x12d   :  { %v588_v62 = vmul.f32 0.1, %v534_v40 }
 0x12f   :  { %846 = vmatpush.bf16.msra.mxu1 %v639_v11  ;;  %v1814_v38 = vpop.permute.xlu2 %750  ;;  %v1413_v11 = vld [vmem:[#allocation7 + $0x74] sm:$0xf0] }
 0x132   :  { %v536_v39 = vpop.f32.mrf.mxu0 }
 0x133   :  { %847 = vmatpush.bf16.msra.mxu1 %v1777_v61  ;;  %v537_v22 = vadd.f32 %v536_v39, %v1765_v24  ;;  %v587_v61 = vmul.f32 0.1, %v532_v44  ;;  %v1816_v39 = vpop.permute.xlu1 %740 }
 0x135   :  { %v589_v48 = vmul.f32 0.1, %v537_v22  ;;  %v619_v53 = vmax.f32 %v532_v44, %v587_v61 }
 0x137   :  { %848 = vmatpush.bf16.msra.mxu1 %v1769_v33  ;;  %v621_v52 = vmax.f32 %v537_v22, %v589_v48  ;;  %v620_v33 = vmax.f32 %v534_v40, %v588_v62  ;;  %v1358_v22 = vor.u32 %v1413_v11, %v1357_v37  ;;  %v1359_v40 = vld [vmem:[#allocation7 + $0x78] sm:$0xf0] }
 0x138   :  { %v1362_v44 = vor.u32 %v1412_v2, %v1359_v40 }
 0x13a   :  { %v538_v43 = vpop.f32.mrf.mxu0 }
 0x13b   :  { %v539_v49 = vadd.f32 %v538_v43, %v1767_v30  ;;  %849 = vmatpush.bf16.msra.mxu1 %v1773_v54  ;;  %v643_v30 = vpack.c.bf16 %v620_v33, %v619_v53  ;;  %v1309_v54 = vld [vmem:[#allocation7 + $0x10] sm:$0xf]  ;;  %v1818_v43 = vpop.permute.xlu2 %725  ;;  %v716_v48 = vpop.permute.xlu1 %715 }
 0x13c   :  { %v1310_v56 = vor.u32 %v1401_v20, %v1309_v54 }
 0x13d   :  { %v590_v50 = vmul.f32 0.1, %v539_v49 }
 0x13f   :  { %v622_v24 = vmax.f32 %v539_v49, %v590_v50  ;;  %850 = vmatpush.bf16.msra.mxu1 %v1781_v5  ;;  %v1317_v5 = vld [vmem:[#allocation7 + $0x20] sm:$0xf]  ;;  %v1820_v49 = vpop.permute.xlu0 %760 }
 0x140   :  { %v1318_v28 = vor.u32 %v1403_v59, %v1317_v5 }
 0x141   :  { %v644_v7 = vpack.c.bf16 %v622_v24, %v621_v52 }
 0x142   :  { %851 = vmatmul.bf16.vlgmr.msra.gmra.mxu1 %v1302_v51 }
 0x143   :  { %898 = vmatpush.bf16.msra.mxu2 %v644_v7  ;;  %v721_v0 = vpop.permute.xlu2 %720  ;;  %v711_v62 = vpop.permute.xlu1 %710 }
 0x147   :  { %899 = vmatpush.bf16.msra.mxu2 %v643_v30  ;;  %v1822_v50 = vpop.permute.xlu0 %735 }
 0x14a   :  { %900 = vmatmul.bf16.vlgmr.msra.gmra.mxu2 %v1306_v45 }
 0x14b   :  { %v696_v61 = vpop.permute.xlu2 %695  ;;  %v686_v52 = vpop.permute.xlu1 %685 }
 0x14f   :  { %v1824_v53 = vpop.permute.xlu0 %730 }
 0x152   :  { %856 = vmatmul.bf16.gmra.mxu1 %v1310_v56 }
 0x153   :  { %v691_v6 = vpop.permute.xlu2 %690 }
 0x157   :  { %v706_v58 = vpop.permute.xlu0 %705 }
 0x15a   :  { %905 = vmatmul.bf16.gmra.mxu2 %v1314_v35 }
 0x15f   :  { %v701_v46 = vpop.permute.xlu0 %700 }
 0x162   :  { %861 = vmatmul.bf16.gmra.mxu1 %v1318_v28 }
 0x16a   :  { %910 = vmatmul.bf16.gmra.mxu2 %v1322_v32 }
 0x172   :  { %866 = vmatmul.bf16.gmra.mxu1 %v1326_v42 }
 0x17a   :  { %915 = vmatmul.bf16.gmra.mxu2 %v1330_v47 }
 0x182   :  { %871 = vmatmul.bf16.gmra.mxu1 %v1334_v17 }
 0x18a   :  { %920 = vmatmul.bf16.gmra.mxu2 %v1338_v14 }
 0x192   :  { %876 = vmatmul.bf16.gmra.mxu1 %v1342_v25 }
 0x19a   :  { %925 = vmatmul.bf16.gmra.mxu2 %v1346_v27 }
 0x1a2   :  { %881 = vmatmul.bf16.gmra.mxu1 %v1350_v31 }
 0x1aa   :  { %930 = vmatmul.bf16.gmra.mxu2 %v1354_v36 }
 0x1b2   :  { %886 = vmatmul.bf16.gmra.mxu1 %v1358_v22 }
 0x1ba   :  { %935 = vmatmul.bf16.gmra.mxu2 %v1362_v44 }
 0x1bf   :  { %v852_v55 = vpop.f32.mrf.mxu1 }
 0x1c0   :  { %v853_v24 = vadd.f32 %v852_v55, %v686_v52 }
 0x1c7   :  { %v854_v51 = vpop.f32.mrf.mxu1 }
 0x1c8   :  { %v855_v30 = vadd.f32 %v854_v51, %v691_v6 }
 0x1cd   :  { %v901_v33 = vpop.f32.mrf.mxu2 }
 0x1ce   :  { %v902_v7 = vadd.f32 %v901_v33, %v853_v24 }
 0x1cf   :  { %v857_v41 = vpop.f32.mrf.mxu1 }
 0x1d0   :  { %v941_v54 = vmul.f32 0.1, %v902_v7  ;;  %v858_v59 = vadd.f32 %v857_v41, %v696_v61 }
 0x1d2   :  { %v957_v35 = vmax.f32 %v902_v7, %v941_v54 }
 0x1d5   :  { %v903_v45 = vpop.f32.mrf.mxu2 }
 0x1d6   :  { %v904_v20 = vadd.f32 %v903_v45, %v855_v30 }
 0x1d7   :  { %v859_v56 = vpop.f32.mrf.mxu1 }
 0x1d8   :  { %v942_v57 = vmul.f32 0.1, %v904_v20  ;;  %v860_v60 = vadd.f32 %v859_v56, %v701_v46 }
 0x1da   :  { %v958_v5 = vmax.f32 %v904_v20, %v942_v57 }
 0x1dc   :  { %v1826_v28 = vpack.c.bf16 %v958_v5, %v957_v35 }
 0x1dd   :  { %v906_v10 = vpop.f32.mrf.mxu2 }
 0x1de   :  { %v907_v29 = vadd.f32 %v906_v10, %v858_v59 }
 0x1df   :  { %v862_v32 = vpop.f32.mrf.mxu1 }
 0x1e0   :  { %v943_v63 = vmul.f32 0.1, %v907_v29  ;;  %v863_v1 = vadd.f32 %v862_v32, %v706_v58 }
 0x1e2   :  { %v959_v15 = vmax.f32 %v907_v29, %v943_v63 }
 0x1e5   :  { %v908_v42 = vpop.f32.mrf.mxu2 }
 0x1e6   :  { %v909_v3 = vadd.f32 %v908_v42, %v860_v60 }
 0x1e7   :  { %v864_v47 = vpop.f32.mrf.mxu1 }
 0x1e8   :  { %v944_v9 = vmul.f32 0.1, %v909_v3  ;;  %v865_v25 = vadd.f32 %v864_v47, %v711_v62 }
 0x1ea   :  { %v960_v17 = vmax.f32 %v909_v3, %v944_v9 }
 0x1ec   :  { %v1828_v18 = vpack.c.bf16 %v960_v17, %v959_v15 }
 0x1ed   :  { %v911_v14 = vpop.f32.mrf.mxu2 }
 0x1ee   :  { %v912_v4 = vadd.f32 %v911_v14, %v863_v1 }
 0x1ef   :  { %v867_v26 = vpop.f32.mrf.mxu1 }
 0x1f0   :  { %v945_v8 = vmul.f32 0.1, %v912_v4  ;;  %v868_v16 = vadd.f32 %v867_v26, %v716_v48 }
 0x1f2   :  { %v961_v31 = vmax.f32 %v912_v4, %v945_v8 }
 0x1f5   :  { %v913_v13 = vpop.f32.mrf.mxu2 }
 0x1f6   :  { %v914_v27 = vadd.f32 %v913_v13, %v865_v25 }
 0x1f7   :  { %v869_v12 = vpop.f32.mrf.mxu1 }
 0x1f8   :  { %v946_v19 = vmul.f32 0.1, %v914_v27  ;;  %v870_v2 = vadd.f32 %v869_v12, %v721_v0 }
 0x1fa   :  { %v962_v21 = vmax.f32 %v914_v27, %v946_v19 }
 0x1fc   :  { %v1830_v36 = vpack.c.bf16 %v962_v21, %v961_v31 }
 0x1fd   :  { %v916_v37 = vpop.f32.mrf.mxu2 }
 0x1fe   :  { %v917_v11 = vadd.f32 %v916_v37, %v868_v16 }
 0x1ff   :  { %v872_v22 = vpop.f32.mrf.mxu1 }
 0x200   :  { %v947_v44 = vmul.f32 0.1, %v917_v11  ;;  %v873_v24 = vadd.f32 %v872_v22, %v1818_v43  ;;  %v1415_v22 = vld [vmem:[%s1863_s5 + $0x8] sm:$0xff] }
 0x202   :  { %v963_v62 = vmax.f32 %v917_v11, %v947_v44  ;;  %v1414_v11 = vld [vmem:[%s1863_s5] sm:$0xff]  ;;  %v1000_v44 = vpop.permute.xlu0 %999 }
 0x205   :  { %v918_v40 = vpop.f32.mrf.mxu2 }
 0x206   :  { %v919_v55 = vadd.f32 %v918_v40, %v870_v2  ;;  %v1416_v2 = vld [vmem:[%s1863_s5 + $0x10] sm:$0xff] }
 0x207   :  { %v874_v51 = vpop.f32.mrf.mxu1 }
 0x208   :  { %v948_v61 = vmul.f32 0.1, %v919_v55  ;;  %v875_v1 = vadd.f32 %v874_v51, %v1824_v53  ;;  %v1010_v51 = vpop.permute.xlu2 %1009 }
 0x20a   :  { %v964_v52 = vmax.f32 %v919_v55, %v948_v61  ;;  %v1015_v61 = vpop.permute.xlu0 %1014 }
 0x20c   :  { %v976_v33 = vpack.c.bf16 %v964_v52, %v963_v62 }
 0x20d   :  { %v921_v7 = vpop.f32.mrf.mxu2 }
 0x20e   :  { %v922_v41 = vadd.f32 %v921_v7, %v873_v24 }
 0x20f   :  { %v877_v6 = vpop.f32.mrf.mxu1 }
 0x210   :  { %v878_v9 = vadd.f32 %v877_v6, %v1822_v50  ;;  %v949_v50 = vmul.f32 0.1, %v922_v41  ;;  %v1117_v24 = vpop.permute.xlu2 %1116 }
 0x212   :  { %v965_v53 = vmax.f32 %v922_v41, %v949_v50 }
 0x215   :  { %v923_v48 = vpop.f32.mrf.mxu2 }
 0x216   :  { %v924_v26 = vadd.f32 %v923_v48, %v875_v1 }
 0x217   :  { %v879_v30 = vpop.f32.mrf.mxu1 }
 0x218   :  { %v880_v42 = vadd.f32 %v879_v30, %v1816_v39  ;;  %v950_v27 = vmul.f32 0.1, %v924_v26  ;;  %v1127_v48 = vpop.permute.xlu2 %1126 }
 0x21a   :  { %v966_v21 = vmax.f32 %v924_v26, %v950_v27 }
 0x21c   :  { %v977_v37 = vpack.c.bf16 %v966_v21, %v965_v53 }
 0x21d   :  { %v926_v45 = vpop.f32.mrf.mxu2 }
 0x21f   :  { %v882_v54 = vpop.f32.mrf.mxu1 }
 0x220   :  { %v883_v29 = vadd.f32 %v882_v54, %v1812_v34 }
 0x225   :  { %v928_v20 = vpop.f32.mrf.mxu2 }
 0x226   :  { %v929_v15 = vadd.f32 %v928_v20, %v880_v42 }
 0x227   :  { %v884_v56 = vpop.f32.mrf.mxu1 }
 0x228   :  { %v885_v10 = vadd.f32 %v884_v56, %v1814_v38  ;;  %v927_v38 = vadd.f32 %v926_v45, %v878_v9  ;;  %v952_v25 = vmul.f32 0.1, %v929_v15 }
 0x22a   :  { %v951_v8 = vmul.f32 0.1, %v927_v38  ;;  %v968_v12 = vmax.f32 %v929_v15, %v952_v25 }
 0x22c   :  { %v967_v31 = vmax.f32 %v927_v38, %v951_v8 }
 0x22d   :  { %v931_v0 = vpop.f32.mrf.mxu2 }
 0x22e   :  { %v932_v63 = vadd.f32 %v931_v0, %v883_v29  ;;  %v978_v16 = vpack.c.bf16 %v968_v12, %v967_v31 }
 0x22f   :  { %v887_v58 = vpop.f32.mrf.mxu1 }
 0x230   :  { %v888_v5 = vadd.f32 %v887_v58, %v1810_v23  ;;  %v953_v14 = vmul.f32 0.1, %v932_v63 }
 0x232   :  { %v969_v39 = vmax.f32 %v932_v63, %v953_v14 }
 0x235   :  { %v933_v57 = vpop.f32.mrf.mxu2 }
 0x236   :  { %v934_v32 = vadd.f32 %v933_v57, %v885_v10 }
 0x237   :  { %v889_v59 = vpop.f32.mrf.mxu1 }
 0x238   :  { %v890_v46 = vadd.f32 %v889_v59, %v1820_v49  ;;  %v954_v17 = vmul.f32 0.1, %v934_v32 }
 0x23a   :  { %v970_v49 = vmax.f32 %v934_v32, %v954_v17 }
 0x23c   :  { %v979_v19 = vpack.c.bf16 %v970_v49, %v969_v39 }
 0x23d   :  { %v936_v35 = vpop.f32.mrf.mxu2 }
 0x23e   :  { %v937_v43 = vadd.f32 %v936_v35, %v888_v5 }
 0x240   :  { %v955_v3 = vmul.f32 0.1, %v937_v43 }
 0x242   :  { %v971_v4 = vmax.f32 %v937_v43, %v955_v3 }
 0x245   :  { %v938_v60 = vpop.f32.mrf.mxu2 }
 0x246   :  { %v939_v47 = vadd.f32 %v938_v60, %v890_v46  ;;  %v1035_v60 = vpop.permute.xlu2 %1034 }
 0x248   :  { %v956_v23 = vmul.f32 0.1, %v939_v47 }
 0x24a   :  { %v972_v34 = vmax.f32 %v939_v47, %v956_v23 }
 0x24c   :  { %v980_v13 = vpack.c.bf16 %v972_v34, %v971_v4 }
 0x24e   :  { %1061 = vmatpush.bf16.msrb.mxu3 %v980_v13 }
 0x252   :  { %1062 = vmatpush.bf16.msrb.mxu3 %v979_v19  ;;  %v1147_v19 = vpop.permute.xlu2 %1146 }
 0x256   :  { %1063 = vmatpush.bf16.msrb.mxu3 %v978_v16 }
 0x25a   :  { %1064 = vmatpush.bf16.msrb.mxu3 %v977_v37 }
 0x25e   :  { %1065 = vmatpush.bf16.msrb.mxu3 %v976_v33  ;;  %v1122_v33 = vpop.permute.xlu0 %1121 }
 0x262   :  { %1066 = vmatpush.bf16.msrb.mxu3 %v1830_v36 }
 0x266   :  { %1067 = vmatpush.bf16.msrb.mxu3 %v1828_v18  ;;  %v1417_v18 = vld [vmem:[%s1863_s5 + $0x18] sm:$0xff]  ;;  %v1030_v0 = vpop.permute.xlu0 %1029 }
 0x26a   :  { %1068 = vmatpush.bf16.msrb.mxu3 %v1826_v28  ;;  %v1005_v28 = vpop.permute.xlu1 %1004 }
 0x26d   :  { %1069 = vmatmul.bf16.vlgmr.msrb.gmra.mxu3 %v1414_v11 }
 0x26e   :  { %v1137_v38 = vpop.permute.xlu0 %1136 }
 0x272   :  { %v1020_v52 = vpop.permute.xlu1 %1019 }
 0x276   :  { %v1152_v37 = vpop.permute.xlu0 %1151 }
 0x27a   :  { %v1025_v41 = vpop.permute.xlu1 %1024 }
 0x27d   :  { %1074 = vmatmul.bf16.gmra.mxu3 %v1415_v22 }
 0x282   :  { %v1132_v43 = vpop.permute.xlu1 %1131 }
 0x28a   :  { %v1142_v13 = vpop.permute.xlu1 %1141 }
 0x28d   :  { %1079 = vmatmul.bf16.gmra.mxu3 %v1416_v2 }
 0x29d   :  { %1084 = vmatmul.bf16.gmra.mxu3 %v1417_v18 }
 0x2f0   :  { %v1070_v36 = vpop.f32.mrf.mxu3 }
 0x2f1   :  { %v1071_v30 = vadd.f32 %v1070_v36, %v1000_v44 }
 0x2f3   :  { %v1090_v57 = vmul.f32 0.1, %v1071_v30 }
 0x2f5   :  { %v1098_v29 = vmax.f32 %v1071_v30, %v1090_v57 }
 0x2f7   :  { %v1154_v15 = vmul.f32 %v1117_v24, %v1098_v29 }
 0x2f8   :  { %v1072_v40 = vpop.f32.mrf.mxu3 }
 0x2f9   :  { %v1073_v6 = vadd.f32 %v1072_v40, %v1005_v28  ;;  %v1179_v28 = vpop.permute.xlu1 %1178 }
 0x2fb   :  { %v1091_v20 = vmul.f32 0.1, %v1073_v6 }
 0x2fd   :  { %v1099_v5 = vmax.f32 %v1073_v6, %v1091_v20 }
 0x2ff   :  { %v1155_v63 = vmul.f32 %v1122_v33, %v1099_v5 }
 0x300   :  { %v1075_v55 = vpop.f32.mrf.mxu3 }
 0x301   :  { %v1076_v45 = vadd.f32 %v1075_v55, %v1010_v51  ;;  %v1162_v14 = vadd.f32 %v1155_v63, %v1154_v15  ;;  %v1181_v51 = vperm.slane %v1179_v28, 0 }
 0x303   :  { %v1092_v58 = vmul.f32 0.1, %v1076_v45 }
 0x305   :  { %v1100_v32 = vmax.f32 %v1076_v45, %v1092_v58 }
 0x307   :  { %v1156_v17 = vmul.f32 %v1127_v48, %v1100_v32 }
 0x308   :  { %v1077_v62 = vpop.f32.mrf.mxu3 }
 0x309   :  { %v1078_v56 = vadd.f32 %v1077_v62, %v1015_v61  ;;  %v1163_v26 = vadd.f32 %v1162_v14, %v1156_v17 }
 0x30b   :  { %v1093_v59 = vmul.f32 0.1, %v1078_v56 }
 0x30d   :  { %v1101_v3 = vmax.f32 %v1078_v56, %v1093_v59 }
 0x30f   :  { %v1157_v4 = vmul.f32 %v1132_v43, %v1101_v3 }
 0x310   :  { %v1080_v7 = vpop.f32.mrf.mxu3 }
 0x311   :  { %v1081_v35 = vadd.f32 %v1080_v7, %v1020_v52  ;;  %v1164_v39 = vadd.f32 %v1163_v26, %v1157_v4 }
 0x313   :  { %v1094_v46 = vmul.f32 0.1, %v1081_v35 }
 0x315   :  { %v1102_v23 = vmax.f32 %v1081_v35, %v1094_v46 }
 0x317   :  { %v1158_v25 = vmul.f32 %v1137_v38, %v1102_v23 }
 0x318   :  { %v1082_v54 = vpop.f32.mrf.mxu3 }
 0x319   :  { %v1083_v10 = vadd.f32 %v1082_v54, %v1025_v41  ;;  %v1165_v50 = vadd.f32 %v1164_v39, %v1158_v25 }
 0x31b   :  { %v1095_v47 = vmul.f32 0.1, %v1083_v10 }
 0x31d   :  { %v1103_v34 = vmax.f32 %v1083_v10, %v1095_v47 }
 0x31f   :  { %v1159_v27 = vmul.f32 %v1142_v13, %v1103_v34 }
 0x320   :  { %v1085_v42 = vpop.f32.mrf.mxu3 }
 0x321   :  { %v1086_v9 = vadd.f32 %v1085_v42, %v1030_v0  ;;  %v1166_v16 = vadd.f32 %v1165_v50, %v1159_v27 }
 0x323   :  { %v1096_v1 = vmul.f32 0.1, %v1086_v9 }
 0x325   :  { %v1104_v49 = vmax.f32 %v1086_v9, %v1096_v1 }
 0x327   :  { %v1160_v31 = vmul.f32 %v1147_v19, %v1104_v49 }
 0x328   :  { %v1087_v8 = vpop.f32.mrf.mxu3 }
 0x329   :  { %v1088_v12 = vadd.f32 %v1087_v8, %v1035_v60  ;;  %v1167_v11 = vadd.f32 %v1166_v16, %v1160_v31 }
 0x32b   :  { %v1097_v21 = vmul.f32 0.1, %v1088_v12 }
 0x32d   :  { %v1105_v53 = vmax.f32 %v1088_v12, %v1097_v21 }
 0x32f   :  { %v1161_v22 = vmul.f32 %v1152_v37, %v1105_v53 }
 0x331   :  { %v1168_v2 = vadd.f32 %v1167_v11, %v1161_v22 }
 0x333   :  { %v1169_v18 = vrot.slane %v1168_v2, 4 }
 0x335   :  { %v1170_v36 = vadd.f32 %v1169_v18, %v1168_v2 }
 0x337   :  { %v1171_v40 = vrot.slane %v1170_v36, 2 }
 0x339   :  { %v1172_v44 = vadd.f32 %v1171_v40, %v1170_v36 }
 0x33b   :  { %v1173_v55 = vrot.slane %v1172_v44, 1 }
 0x33d   :  { %v1174_v61 = vadd.f32 %v1173_v55, %v1172_v44 }
 0x33f   :  { %v1182_v62 = vadd.f32 %v1181_v51, %v1174_v61 }
 0x341   :  { %v1379_v52 = vmul.f32 -1.442695, %v1182_v62 }
 0x343   :  { %1433 = vpow2.f32 %v1379_v52 }
 0x349   :  { %v1434_v24 = vpop.eup %1433 }
 0x34a   :  { %v1186_v33 = vadd.f32 1.0, %v1434_v24 }
 0x34c   :  { %1435 = vrcp.f32 %v1186_v33  ;;  %v1198_v48 = vand.u32 2147483648, %v1186_v33  ;;  %v1196_v45 = vand.u32 2147483647, %v1186_v33  ;;  %vm1192_vm2 = vweird.f32 %v1186_v33 }
 0x34e   :  { %v1199_v20 = vor.u32 1.1754944e-38, %v1198_v48  ;;  %vm1197_vm4 = vcmp.eq.f32.partialorder %v1196_v45, 8.507059e+37 }
 0x352   :  { %v1436_v7 = vpop.eup %1435 }
 0x353   :  { %v1188_v41 = vmul.f32 %v1436_v7, %v1186_v33  ;;  %vm1193_vm1 = vweird.f32 %v1436_v7 }
 0x354   :  { %vm1194_vm3 = vmor %vm1192_vm2, %vm1193_vm1 }
 0x355   :  { %v1189_v6 = vsub.f32 1.0, %v1188_v41 }
 0x357   :  { %v1190_v30 = vmul.f32 %v1436_v7, %v1189_v6 }
 0x359   :  { %v1191_v54 = vadd.f32 %v1436_v7, %v1190_v30 }
 0x35b   :  { %v1195_v56 = vsel %vm1194_vm3, %v1436_v7, %v1191_v54 }
 0x35c   :  { %v1200_v0 = vsel %vm1197_vm4, %v1199_v20, %v1195_v56 }
 0x35d   :  { %v1202_v57 = vmul.f32 100.0, %v1200_v0 }
 0x35f   :  { %1203 = vst [vmem:[%s1867_s9] sm:$0x1] %v1202_v57 }
 0x360   :  { %1208 = vsyncpa [#allocation4], 1 }
 0x361   :  { %1209 = vsyncpa [#allocation6], 1 }
 0x362   :  { %1210 = vsyncpa [#allocation9], 1 }

</bundles_post_ra>
